<compile_context>
chip_gen: v5e
topology: v5e:2x2
jax: 0.10.0
libtpu: 0.0.40
codegen_flags: <defaults>
</compile_context>

<pallas_src>
import math

import jax
import jax.numpy as jnp
from jax.experimental import pallas as pl
from jax.experimental.pallas import tpu as pltpu


def _copy_kernel(x_ref, o_ref):
    # Flat identity copy of one tile (lane-dense whenever the last block dim
    # is a multiple of 128 or the full array extent).
    o_ref[...] = x_ref[...]


_MAX_LANES = 4096        # cap on the re-flattened lane width
_MIN_GRID_STEPS = 4      # target >= 4 grid steps so DMAs pipeline


def _round_up(x, m):
    return ((x + m - 1) // m) * m


def _resolve_target(C, H, W):
    if H is None and W is None:
        return (C,)
    if W is None:
        return (C, H)
    return (C, H, W)


def _budgets():
    """(max_block_bytes, vmem_limit_bytes), derived per TPU generation."""
    vmem = 64 * 1024 * 1024
    try:
        vmem = pltpu.get_tpu_info().vmem_capacity_bytes
    except Exception:
        pass
    if vmem > 64 * 1024 * 1024:
        # v5e / v6e: 128 MiB VMEM -> bigger tiles amortize per-step overhead.
        return 14 * 1024 * 1024, 64 * 1024 * 1024
    # v7x-class: 64 MiB physical VMEM -> leave headroom for compiler scratch.
    return 6 * 1024 * 1024, 32 * 1024 * 1024


def _lane_dense_width(total):
    """Largest multiple-of-128 divisor of `total` (<= _MAX_LANES), or None."""
    L = (min(total, _MAX_LANES) // 128) * 128
    while L >= 128:
        if total % L == 0:
            return L
        L -= 128
    return None


def pallas_view(x, C, H=None, W=None, *, force_kernel=False, donate=False,
                max_block_bytes=None):
    """Equivalent of View(C, H, W).forward(x) for an arbitrary-shaped input x."""
    N = x.shape[0]
    feat = math.prod(x.shape[1:]) if x.ndim > 1 else 1
    tgt = _resolve_target(C, H, W)
    assert math.prod(tgt) == feat, "view size mismatch"
    out_shape = (N,) + tgt

    # A view is metadata-only in XLA: never launch a kernel unless forced.
    if not force_kernel:
        return x.reshape(out_shape)

    itemsize = jnp.dtype(x.dtype).itemsize
    total = N * feat
    default_block, vmem_limit = _budgets()
    if max_block_bytes is None:
        max_block_bytes = default_block
    # Never go below one (8, 128) native tile.
    max_block_bytes = max(max_block_bytes, 8 * 128 * itemsize)

    L = _lane_dense_width(total)
    if L is not None:
        # Order-preserving re-flatten to a lane-dense slab, independent of feat.
        rows, cols = total // L, L
        tf = cols
    else:
        # No multiple-of-128 divisor of total: keep (N, feat) and tile both
        # axes so a wide feature dim can never exceed the VMEM budget.
        rows, cols = N, feat
        tf = min(_round_up(cols, 128),
                 max(128, (max_block_bytes // (8 * itemsize) // 128) * 128))
        if tf >= cols:
            tf = cols  # full-extent feature block (always legal)

    x_flat = x.reshape(rows, cols)

    # Row tile: multiple of 8 sublanes, capped by (a) the per-block VMEM budget
    # and (b) a >= _MIN_GRID_STEPS grid so prefetch/writeback DMAs overlap.
    bytes_per_block_row = tf * itemsize
    tm_budget = max(8, (max_block_bytes // bytes_per_block_row // 8) * 8)
    tm_pipeline = max(8, _round_up(pl.cdiv(rows, _MIN_GRID_STEPS), 8))
    tm = min(tm_budget, tm_pipeline)
    if tm >= rows:
        tm = rows  # single block along rows; full-extent dim is always legal

    grid = (pl.cdiv(rows, tm), pl.cdiv(cols, tf))

    out_flat = pl.pallas_call(
        _copy_kernel,
        out_shape=jax.ShapeDtypeStruct((rows, cols), x.dtype),
        grid=grid,
        in_specs=[pl.BlockSpec((tm, tf), lambda i, j: (i, j))],
        out_specs=pl.BlockSpec((tm, tf), lambda i, j: (i, j)),
        compiler_params=pltpu.CompilerParams(
            dimension_semantics=("parallel", "parallel"),
            vmem_limit_bytes=vmem_limit,
        ),
        # Output is bit-identical to the input: aliasing skips a second HBM
        # allocation when the caller can donate x.
        input_output_aliases=({0: 0} if donate else {}),
    )(x_flat)

    # Target (C,[H,[W]]) shape applied outside the kernel (metadata-only).
    return out_flat.reshape(out_shape)


if __name__ == "__main__":
    key = jax.random.PRNGKey(0)

    # Case 0: default path — metadata-only reshape, no kernel launch.
    x0 = jax.random.normal(key, (2, 4, 16, 16), dtype=jnp.float32)
    y0 = pallas_view(x0, C=1024, H=None, W=None)
    jax.block_until_ready(y0)
    assert y0.shape == (2, 1024)
    assert jnp.allclose(y0, x0.reshape(2, 1024))

    # Case 1: full 4D view — View(C=4, H=16, W=16) on a (2, 1024) input
    # (forced kernel, lane-dense re-flatten to (1, 2048)).
    x1 = jax.random.normal(key, (2, 1024), dtype=jnp.float32)
    y1 = pallas_view(x1, C=4, H=16, W=16, force_kernel=True)
    jax.block_until_ready(y1)
    assert y1.shape == (2, 4, 16, 16)
    assert jnp.allclose(y1, x1.reshape(2, 4, 16, 16))

    # Case 2: W is None — View(C=8, H=128) on a (2, 8, 8, 16) NCHW input.
    x2 = jax.random.normal(jax.random.PRNGKey(1), (2, 8, 8, 16), dtype=jnp.float32)
    y2 = pallas_view(x2, C=8, H=128, W=None, force_kernel=True)
    jax.block_until_ready(y2)
    assert y2.shape == (2, 8, 128)
    assert jnp.allclose(y2, x2.reshape(2, 8, 128))

    # Case 3: H and W are None — View(C=1024) flattening a (2, 4, 16, 16) input.
    x3 = jax.random.normal(jax.random.PRNGKey(2), (2, 4, 16, 16), dtype=jnp.float32)
    y3 = pallas_view(x3, C=1024, H=None, W=None, force_kernel=True)
    jax.block_until_ready(y3)
    assert y3.shape == (2, 1024)
    assert jnp.allclose(y3, x3.reshape(2, 1024))

    # Case 4: multi-step pipelined grid — (256, 1024) elements re-flatten to
    # (64, 4096); a small block budget yields tm=8 -> grid of 8 steps.
    x4 = jax.random.normal(jax.random.PRNGKey(3), (256, 4, 16, 16), dtype=jnp.float32)
    y4 = pallas_view(x4, C=4, H=16, W=16, force_kernel=True,
                     max_block_bytes=32 * 1024)
    jax.block_until_ready(y4)
    assert y4.shape == (256, 4, 16, 16)
    assert jnp.allclose(y4, x4.reshape(256, 4, 16, 16))

    # Case 5: total has no multiple-of-128 divisor — fallback (N, feat) tiling
    # with full-extent blocks.  View(C=75) on a (2, 3, 5, 5) input.
    x5 = jax.random.normal(jax.random.PRNGKey(4), (2, 3, 5, 5), dtype=jnp.float32)
    y5 = pallas_view(x5, C=75, H=None, W=None, force_kernel=True)
    jax.block_until_ready(y5)
    assert y5.shape == (2, 75)
    assert jnp.allclose(y5, x5.reshape(2, 75))

    print("KERNEL_OK")
</pallas_src>

<mosaic_0001>
module attributes {stable_mosaic.version = 11 : i64} {
  func.func @_copy_kernel(%arg0: i32, %arg1: i32, %arg2: memref<1x2048xf32, #tpu.memory_space<vmem>>, %arg3: memref<1x2048xf32, #tpu.memory_space<vmem>>) attributes {dimension_semantics = [#tpu.dimension_semantics<parallel>, #tpu.dimension_semantics<parallel>], iteration_bounds = array<i64: 1, 1>, scalar_prefetch = 0 : i64, scratch_operands = 0 : i64, tpu.core_type = #tpu.core_type<tc>, window_params = [{transform_indices = @transform_0, window_bounds = array<i64: 1, 2048>}, {transform_indices = @transform_1, window_bounds = array<i64: 1, 2048>}]} {
    %c0 = arith.constant 0 : index
    %c0_0 = arith.constant 0 : index
    %0 = vector.load %arg2[%c0, %c0_0] : memref<1x2048xf32, #tpu.memory_space<vmem>>, vector<1x2048xf32>
    %c0_1 = arith.constant 0 : index
    %c0_2 = arith.constant 0 : index
    %1 = vector.load %arg3[%c0_1, %c0_2] : memref<1x2048xf32, #tpu.memory_space<vmem>>, vector<1x2048xf32>
    tpu.vector_store %arg3[%c0_1, %c0_2], %0 {strides = array<i32>} : memref<1x2048xf32, #tpu.memory_space<vmem>>, vector<1x2048xf32>,
    return
  }
  func.func @transform_0(%arg0: i32, %arg1: i32) -> (i32, i32) {
    %c0_i32 = arith.constant 0 : i32
    return %arg0, %arg1 : i32, i32
  }
  func.func @transform_1(%arg0: i32, %arg1: i32) -> (i32, i32) {
    %c0_i32 = arith.constant 0 : i32
    return %arg0, %arg1 : i32, i32
  }
}

</mosaic_0001>

<bundles_post_ra>
// kernel: tpu_custom_call.1
= control target key start
LH: loop header
LB: loop body
LE: loop exit
PB: predicated region body
PF: predicated region fallthrough
CT: control target
= control target key end

     0   :  { %6 = vsyncpa [#allocation3], 0  ;;  %s116_s0 = inlined_call_operand.hbm [shape: f32[1,2048], index: 0, kind: input, shape index: {}]   ;;  %s117_s1 = inlined_call_operand.hbm [shape: f32[1,2048], index: 1, kind: output, shape index: {}]  }
   0x1   :  { %7 = vsyncpa [#allocation4], 0  ;;  %s13_s8 = sshll.u32 %s116_s0, 4  ;;  %s98_s9 = smov [#allocation2]   ;;  %s14_s8 = int_to_ptr.hbm [resolvable:$true] %s13_s8 }
   0x2   :  { %s15_s10 = sshll.u32 %s98_s9, 4  ;;  %s16_s10 = int_to_ptr.vmem [resolvable:$true] %s15_s10 }
   0x3   :  { %18 = dma.hbm_to_vmem [thread:$0]  %s14_s8, 256, %s16_s10, [#allocation3]  }
   0x4   :  { %94 = dma.done.wait [#allocation3], 256  }
   0x5   :  { %95 = vsyncadd [#allocation3], 4294967040  ;;  %s99_s11 = smov [#allocation5]   ;;  %s34_s15 = sshll.u32 %s117_s1, 4  ;;  %v23_v0 = vld [vmem:[#allocation2] sm:$0xff]  ;;  %v24_v1 = vld [vmem:[#allocation2 + $0x8] sm:$0xff]  ;;  %s35_s15 = int_to_ptr.hbm [resolvable:$true] %s34_s15 }
   0x6   :  { %s32_s12 = sshll.u32 %s99_s11, 4  ;;  %25 = vst [vmem:[#allocation5] sm:$0xff] %v23_v0  ;;  %s33_s12 = int_to_ptr.vmem [resolvable:$true] %s32_s12 }
   0x7   :  { %26 = vst [vmem:[#allocation5 + $0x8] sm:$0xff] %v24_v1 }
   0x8   :  { %37 = dma.vmem_to_hbm [thread:$0]  %s33_s12, 256, %s35_s15, [#allocation4]  }
   0x9   :  { %96 = dma.done.wait [#allocation4], 256  }
   0xa   :  { %97 = vsyncadd [#allocation4], 4294967040 }
   0xb   :  { %42 = vsyncpa [#allocation3], 1 }
   0xc   :  { %43 = vsyncpa [#allocation4], 1 }

</bundles_post_ra>
